<compile_context>
chip_gen: v6e
topology: v6e:2x2x1
jax: 0.10.0
libtpu: 0.0.40
codegen_flags: <defaults>
</compile_context>

<pallas_src>
import math
import numpy as np
import jax
import jax.numpy as jnp
from jax.experimental import pallas as pl
from jax.experimental.pallas import tpu as pltpu

_VMEM_LIMIT = 48 * 1024 * 1024   # v7x-safe scoped-VMEM cap (64 MiB physical); also fine on v5e/v6e.


# ----------------------------------------------------------------------------
# Small helpers (host side)
# ----------------------------------------------------------------------------
def _round_up(n, m):
    return ((n + m - 1) // m) * m


def _pick_lane_tile(V, max_tile):
    """Largest multiple of 128 that divides V and is <= max_tile; else the full V (one tile)."""
    t = max(128, (max_tile // 128) * 128)
    while t >= 128:
        if V % t == 0:
            return t
        t -= 128
    return V


def _nbytes(shape, dtype):
    return int(np.prod(shape)) * jnp.dtype(dtype).itemsize


def interp_basis(L, interval):
    """Hat (linear) interpolation from anchor degrees to all (L+1)^2 coefficients."""
    anchors = list(range(0, L + 1, interval))
    if anchors[-1] != L:
        anchors.append(L)
    na = len(anchors)
    B_deg = np.zeros((na, L + 1), dtype=np.float32)
    for l in range(L + 1):
        if l <= anchors[0]:
            B_deg[0, l] = 1.0
        elif l >= anchors[-1]:
            B_deg[-1, l] = 1.0
        else:
            for a in range(na - 1):
                lo, hi = anchors[a], anchors[a + 1]
                if lo <= l <= hi:
                    t = (l - lo) / float(hi - lo)
                    B_deg[a, l] = 1.0 - t
                    B_deg[a + 1, l] = t
                    break
    reps = [2 * l + 1 for l in range(L + 1)]
    return np.repeat(B_deg, reps, axis=1)  # [num_anchor, (L+1)^2]


# ----------------------------------------------------------------------------
# Kernel 1: SHT (V-tiled reduction, MXU) + SHConv channel mix on the last tile
# ----------------------------------------------------------------------------
def _spectral_shconv_kernel(x_ref, yinv_ref, wspec_ref, y_ref, c_acc):
    # x_ref    : [B*in_ch, TV]          bf16  (V-slice, streamed)
    # yinv_ref : [TV, Kpad]             bf16  (area folded in, V-slice, streamed)
    # wspec_ref: [in_ch, out_ch, Kpad]  bf16  (resident across all tiles)
    # y_ref    : [B*out_ch, Kpad]       bf16  (written on the last tile only)
    # c_acc    : [B*in_ch, Kpad]        f32   VMEM scratch accumulator
    v = pl.program_id(0)

    @pl.when(v == 0)
    def _init():
        c_acc[...] = jnp.zeros_like(c_acc)

    # SHT partial contraction over this V slice (MXU, f32 accumulation).
    c_acc[...] += jnp.dot(x_ref[...], yinv_ref[...], preferred_element_type=jnp.float32)

    @pl.when(v == pl.num_programs(0) - 1)
    def _finalize():
        in_ch, out_ch, _ = wspec_ref.shape
        bsz = y_ref.shape[0] // out_ch
        # SHConv: y[b*out_ch+o, k] = sum_i c[b*in_ch+i, k] * wspec[i, o, k].
        # Static 2-D row slices of the accumulator (no sub-(8,128) reshape); f32 math with
        # bf16 weights (implicit upcast).
        # TODO(synk): at production in_ch use lax.fori_loop(..., unroll=8) instead.
        rows = []
        for b in range(bsz):
            acc = c_acc[pl.ds(b * in_ch, 1), :] * wspec_ref[0]
            for i in range(1, in_ch):
                acc = acc + c_acc[pl.ds(b * in_ch + i, 1), :] * wspec_ref[i]
            rows.append(acc)
        y_ref[...] = jnp.concatenate(rows, axis=0).astype(y_ref.dtype)


# ----------------------------------------------------------------------------
# Kernel 2: fused ISHT + impulse conv (one MXU matmul per V tile) + one-pass BN stats
# ----------------------------------------------------------------------------
def _synth_stats_kernel(lhs_ref, rhs_ref, z_ref, stats_ref):
    # lhs_ref  : [B*out_ch, Ctot]  bf16  resident ([y | blockdiag(W_imp)], Ctot = Kpad + Cpad)
    # rhs_ref  : [Ctot, TV]        bf16  streamed ([[Y],[x]] V-slice, concatenated on host)
    # z_ref    : [B*out_ch, TV]    f32   unnormalized pre-BN output slice
    # stats_ref: [1, B*out_ch, 2]  f32   per-tile (sum, sum of squares) per row
    z = jnp.dot(lhs_ref[...], rhs_ref[...], preferred_element_type=jnp.float32)
    z_ref[...] = z
    s1 = jnp.sum(z, axis=1, keepdims=True)
    s2 = jnp.sum(z * z, axis=1, keepdims=True)
    stats_ref[...] = jnp.concatenate([s1, s2], axis=1)[None, :, :]


# ----------------------------------------------------------------------------
# Kernel 3: BatchNorm apply (+ identity nonlinearity)
# ----------------------------------------------------------------------------
def _bn_apply_kernel(z_ref, scale_ref, shift_ref, o_ref):
    # z_ref: [B*out_ch, TV] f32 ; scale/shift: [B*out_ch, 1] f32 resident ; o_ref like z_ref.
    o_ref[...] = z_ref[...] * scale_ref[...] + shift_ref[...]


# ----------------------------------------------------------------------------
# Wrapper
# ----------------------------------------------------------------------------
def shconv_block(x, area, Y, Y_inv, weight_anchor, B_interp, W_imp, gamma, beta,
                 *, lane_tile=512, eps=1e-5):
    Bsz, in_ch, V = x.shape
    out_ch = weight_anchor.shape[0]
    K = Y.shape[0]
    Kpad = _round_up(K, 128)                 # lane-dense harmonic axis
    Cpad = _round_up(Bsz * in_ch, 128)       # impulse contraction padded to a clean MXU tile
    Ctot = Kpad + Cpad
    TV = _pick_lane_tile(V, lane_tile)       # V tile (lane-dense)
    nV = V // TV

    f32, bf16 = jnp.float32, jnp.bfloat16

    # ---- host-side constant prep (done once per call, tiny vs the V-sized work) ----
    w_full = jnp.einsum("oia,ak->oik", weight_anchor, B_interp)                     # [o,i,K]
    w_spec = jnp.pad(jnp.transpose(w_full, (1, 0, 2)),
                     ((0, 0), (0, 0), (0, Kpad - K))).astype(bf16)                  # [i,o,Kpad]
    yinv_s = jnp.pad(area[:, None] * Y_inv, ((0, 0), (0, Kpad - K))).astype(bf16)   # [V,Kpad]
    x_flat = x.reshape(Bsz * in_ch, V).astype(bf16)                                 # [B*i,V]

    # ---- kernel 1: SHT (V-tiled reduction, pipelined DMA) + fused SHConv ----
    y = pl.pallas_call(
        _spectral_shconv_kernel,
        out_shape=jax.ShapeDtypeStruct((Bsz * out_ch, Kpad), bf16),
        grid=(nV,),
        in_specs=[
            pl.BlockSpec((Bsz * in_ch, TV), lambda v: (0, v)),
            pl.BlockSpec((TV, Kpad), lambda v: (v, 0)),
            pl.BlockSpec((in_ch, out_ch, Kpad), lambda v: (0, 0, 0)),   # resident
        ],
        out_specs=pl.BlockSpec((Bsz * out_ch, Kpad), lambda v: (0, 0)),
        scratch_shapes=[pltpu.VMEM((Bsz * in_ch, Kpad), f32)],
        compiler_params=pltpu.CompilerParams(
            dimension_semantics=("arbitrary",), vmem_limit_bytes=_VMEM_LIMIT),
        cost_estimate=pl.CostEstimate(
            flops=2 * Bsz * in_ch * V * Kpad + 2 * Bsz * in_ch * out_ch * Kpad,
            transcendentals=0,
            bytes_accessed=_nbytes((Bsz * in_ch, V), bf16) + _nbytes((V, Kpad), bf16)
                           + _nbytes((in_ch, out_ch, Kpad), bf16)
                           + _nbytes((Bsz * out_ch, Kpad), bf16)),
    )(x_flat, yinv_s, w_spec)

    # ---- host-side: lhs/rhs of the fused ISHT+impulse matmul (no in-kernel concat) ----
    wimp_bd = jnp.kron(jnp.eye(Bsz, dtype=W_imp.dtype), W_imp)                      # [B*o,B*i]
    wimp_bd = jnp.pad(wimp_bd, ((0, 0), (0, Cpad - Bsz * in_ch))).astype(bf16)      # pad to 128
    lhs = jnp.concatenate([y, wimp_bd], axis=1)                                     # [B*o,Ctot]
    y_basis = jnp.pad(Y, ((0, Kpad - K), (0, 0))).astype(bf16)                      # [Kpad,V]
    x_pad = jnp.pad(x_flat, ((0, Cpad - Bsz * in_ch), (0, 0)))                      # [Cpad,V]
    rhs = jnp.concatenate([y_basis, x_pad], axis=0)                                 # [Ctot,V]

    # ---- kernel 2: per-V-tile ISHT + impulse + one-pass BN partial stats ("parallel") ----
    z, stats = pl.pallas_call(
        _synth_stats_kernel,
        out_shape=(jax.ShapeDtypeStruct((Bsz * out_ch, V), f32),
                   jax.ShapeDtypeStruct((nV, Bsz * out_ch, 2), f32)),
        grid=(nV,),
        in_specs=[
            pl.BlockSpec((Bsz * out_ch, Ctot), lambda v: (0, 0)),       # resident
            pl.BlockSpec((Ctot, TV), lambda v: (0, v)),
        ],
        out_specs=(pl.BlockSpec((Bsz * out_ch, TV), lambda v: (0, v)),
                   pl.BlockSpec((1, Bsz * out_ch, 2), lambda v: (v, 0, 0))),
        compiler_params=pltpu.CompilerParams(
            dimension_semantics=("parallel",), vmem_limit_bytes=_VMEM_LIMIT),
        cost_estimate=pl.CostEstimate(
            flops=2 * Bsz * out_ch * Ctot * V + 3 * Bsz * out_ch * V,
            transcendentals=0,
            bytes_accessed=_nbytes((Bsz * out_ch, Ctot), bf16) + _nbytes((Ctot, V), bf16)
                           + _nbytes((Bsz * out_ch, V), f32)
                           + _nbytes((nV, Bsz * out_ch, 2), f32)),
    )(lhs, rhs)

    # ---- host-side: finalize BatchNorm statistics (out_ch-sized, negligible) ----
    per_row = jnp.sum(stats, axis=0)                                    # [B*out_ch, 2]
    per_ch = jnp.sum(per_row.reshape(Bsz, out_ch, 2), axis=0)           # [out_ch, 2]
    n = float(Bsz * V)
    mean = per_ch[:, 0] / n
    var = per_ch[:, 1] / n - mean * mean                                # biased variance (f32 sums)
    inv = jax.lax.rsqrt(var + eps)
    sc = gamma * inv
    sh = beta - mean * sc
    scale_rows = jnp.tile(sc, Bsz).reshape(Bsz * out_ch, 1).astype(f32)
    shift_rows = jnp.tile(sh, Bsz).reshape(Bsz * out_ch, 1).astype(f32)

    # ---- kernel 3: BN apply (identity nonlinearity), V-tiled, lane-dense stores ----
    out2d = pl.pallas_call(
        _bn_apply_kernel,
        out_shape=jax.ShapeDtypeStruct((Bsz * out_ch, V), f32),
        grid=(nV,),
        in_specs=[
            pl.BlockSpec((Bsz * out_ch, TV), lambda v: (0, v)),
            pl.BlockSpec((Bsz * out_ch, 1), lambda v: (0, 0)),          # resident
            pl.BlockSpec((Bsz * out_ch, 1), lambda v: (0, 0)),          # resident
        ],
        out_specs=pl.BlockSpec((Bsz * out_ch, TV), lambda v: (0, v)),
        compiler_params=pltpu.CompilerParams(
            dimension_semantics=("parallel",), vmem_limit_bytes=_VMEM_LIMIT),
        cost_estimate=pl.CostEstimate(
            flops=2 * Bsz * out_ch * V, transcendentals=0,
            bytes_accessed=2 * _nbytes((Bsz * out_ch, V), f32)),
    )(z, scale_rows, shift_rows)

    return out2d.reshape(Bsz, out_ch, V)


# ----------------------------------------------------------------------------
# Pure-JAX reference for verification.
# `dtype=bfloat16` mirrors the kernel's precision choices (bf16 operands, f32 accumulation);
# `dtype=float32` is the exact module semantics.
# ----------------------------------------------------------------------------
def shconv_block_ref(x, area, Y, Y_inv, weight_anchor, B_interp, W_imp, gamma, beta,
                     dtype=jnp.float32):
    hi = jax.lax.Precision.HIGHEST
    q = lambda a: a.astype(dtype).astype(jnp.float32)
    xq = q(x)
    yinvq = q(area[:, None] * Y_inv)
    yq = q(Y)
    wimpq = q(W_imp)
    c = jnp.einsum("biv,vk->bik", xq, yinvq, precision=hi)
    w_full = jnp.einsum("oia,ak->oik", weight_anchor, B_interp, precision=hi)
    yspec = jnp.einsum("bik,oik->bok", c, q(w_full), precision=hi)
    spec = jnp.einsum("bok,kv->bov", q(yspec), yq, precision=hi)
    imp = jnp.einsum("oi,biv->bov", wimpq, xq, precision=hi)
    z = spec + imp
    mean = z.mean(axis=(0, 2), keepdims=True)
    var = ((z - mean) ** 2).mean(axis=(0, 2), keepdims=True)
    return (z - mean) * jax.lax.rsqrt(var + 1e-5) * gamma[None, :, None] + beta[None, :, None]


if __name__ == "__main__":
    # Small synthetic shapes consistent with the module
    batch, in_ch, out_ch = 2, 4, 8
    L, interval = 8, 4
    V = 256                      # n_vertex
    K = (L + 1) ** 2             # 81 harmonic coefficients

    B_interp = jnp.asarray(interp_basis(L, interval))         # [num_anchor, K]
    num_anchor = B_interp.shape[0]

    key = jax.random.PRNGKey(0)
    k1, k2, k3, k4, k5, k6 = jax.random.split(key, 6)

    x = jax.random.normal(k1, (batch, in_ch, V), dtype=jnp.float32)
    Y = jax.random.normal(k2, (K, V), dtype=jnp.float32) * 0.1         # harmonic basis
    Y_inv = jax.random.normal(k3, (V, K), dtype=jnp.float32) * 0.1     # inverse basis
    area = jax.random.uniform(k4, (V,), dtype=jnp.float32, minval=0.5, maxval=1.5)

    # SHConv anchor weights (kaiming-uniform-like deterministic init)
    bound = 1.0 / math.sqrt(in_ch * num_anchor)
    weight_anchor = jax.random.uniform(
        k5, (out_ch, in_ch, num_anchor), dtype=jnp.float32, minval=-bound, maxval=bound)

    # impulse 1x1 conv weight (no bias since bn=True)
    bound = 1.0 / math.sqrt(in_ch)
    W_imp = jax.random.uniform(k6, (out_ch, in_ch), dtype=jnp.float32, minval=-bound, maxval=bound)

    # BatchNorm1d affine params (PyTorch default init)
    gamma = jnp.ones((out_ch,), dtype=jnp.float32)
    beta = jnp.zeros((out_ch,), dtype=jnp.float32)

    # lane_tile=128 -> V=256 gives a 2-step grid, exercising the V-tiled reduction / parallel paths.
    out = shconv_block(x, area, Y, Y_inv, weight_anchor, B_interp, W_imp, gamma, beta,
                       lane_tile=128)
    out = jax.block_until_ready(out)

    # Structural check (reference quantized to bf16 the same way the kernel operands are).
    ref_bf16 = shconv_block_ref(x, area, Y, Y_inv, weight_anchor, B_interp, W_imp,
                                gamma, beta, dtype=jnp.bfloat16)
    if not jnp.allclose(out, ref_bf16, rtol=1e-3, atol=1e-3):
        raise AssertionError("Pallas output does not match bf16-matched reference")

    # Loose semantic check against the full-f32 module math (bf16 MXU error budget).
    ref_f32 = shconv_block_ref(x, area, Y, Y_inv, weight_anchor, B_interp, W_imp,
                               gamma, beta, dtype=jnp.float32)
    if not jnp.allclose(out, ref_f32, rtol=1e-1, atol=1e-1):
        raise AssertionError("Pallas output diverges from f32 semantics beyond bf16 budget")

    print("KERNEL_OK")
</pallas_src>

<mosaic_0001>
module attributes {stable_mosaic.version = 11 : i64} {
  func.func @_spectral_shconv_kernel(%arg0: i32, %arg1: memref<8x128xbf16, #tpu.memory_space<vmem>>, %arg2: memref<128x128xbf16, #tpu.memory_space<vmem>>, %arg3: memref<4x8x128xbf16, #tpu.memory_space<vmem>>, %arg4: memref<16x128xbf16, #tpu.memory_space<vmem>>, %arg5: memref<8x128xf32, #tpu.memory_space<vmem>>) attributes {dimension_semantics = [#tpu.dimension_semantics<arbitrary>], iteration_bounds = array<i64: 2>, scalar_prefetch = 0 : i64, scratch_operands = 1 : i64, tpu.core_type = #tpu.core_type<tc>, window_params = [{transform_indices = @transform_0, window_bounds = array<i64: 8, 128>}, {transform_indices = @transform_1, window_bounds = array<i64: 128, 128>}, {pipeline_mode = #tpu.pipeline_mode<synchronous>, transform_indices = @transform_2, window_bounds = array<i64: 4, 8, 128>}, {pipeline_mode = #tpu.pipeline_mode<synchronous>, transform_indices = @transform_3, window_bounds = array<i64: 16, 128>}]} {
    %c0_i32 = arith.constant 0 : i32
    %0 = arith.cmpi eq, %arg0, %c0_i32 : i32
    %1 = arith.extui %0 : i1 to i32
    %c0_i32_0 = arith.constant 0 : i32
    %2 = arith.cmpi ne, %1, %c0_i32_0 : i32
    scf.if %2 {
      %cst_9 = arith.constant 0.000000e+00 : f32
      %12 = vector.broadcast %cst_9 : f32 to vector<8x128xf32>
      %c0_10 = arith.constant 0 : index
      %c0_11 = arith.constant 0 : index
      %13 = vector.load %arg5[%c0_10, %c0_11] : memref<8x128xf32, #tpu.memory_space<vmem>>, vector<8x128xf32>
      tpu.vector_store %arg5[%c0_10, %c0_11], %12 {strides = array<i32>} : memref<8x128xf32, #tpu.memory_space<vmem>>, vector<8x128xf32>,
    } else {
    }
    %c0 = arith.constant 0 : index
    %c0_1 = arith.constant 0 : index
    %3 = vector.load %arg5[%c0, %c0_1] : memref<8x128xf32, #tpu.memory_space<vmem>>, vector<8x128xf32>
    %c0_2 = arith.constant 0 : index
    %c0_3 = arith.constant 0 : index
    %4 = vector.load %arg1[%c0_2, %c0_3] : memref<8x128xbf16, #tpu.memory_space<vmem>>, vector<8x128xbf16>
    %c0_4 = arith.constant 0 : index
    %c0_5 = arith.constant 0 : index
    %5 = vector.load %arg2[%c0_4, %c0_5] : memref<128x128xbf16, #tpu.memory_space<vmem>>, vector<128x128xbf16>
    %cst = arith.constant dense<0.000000e+00> : vector<8x128xf32>
    %6 = tpu.matmul %4, %5, %cst {dimension_numbers = #tpu.dot_dimension_numbers<[1], [0], [0], [1], [0, 0, 1, 1], [], []>} : vector<8x128xbf16>, vector<128x128xbf16>, vector<8x128xf32> -> vector<8x128xf32>
    %7 = arith.addf %3, %6 : vector<8x128xf32>
    %c0_6 = arith.constant 0 : index
    %c0_7 = arith.constant 0 : index
    %8 = vector.load %arg5[%c0_6, %c0_7] : memref<8x128xf32, #tpu.memory_space<vmem>>, vector<8x128xf32>
    tpu.vector_store %arg5[%c0_6, %c0_7], %7 {strides = array<i32>} : memref<8x128xf32, #tpu.memory_space<vmem>>, vector<8x128xf32>,
    %c1_i32 = arith.constant 1 : i32
    %9 = arith.cmpi eq, %arg0, %c1_i32 : i32
    %10 = arith.extui %9 : i1 to i32
    %c0_i32_8 = arith.constant 0 : i32
    %11 = arith.cmpi ne, %10, %c0_i32_8 : i32
    scf.if %11 {
      %c0_9 = arith.constant 0 : index
      %c0_10 = arith.constant 0 : index
      %12 = vector.load %arg5[%c0_9, %c0_10] : memref<8x128xf32, #tpu.memory_space<vmem>>, vector<1x128xf32>
      %c0_11 = arith.constant 0 : index
      %c0_12 = arith.constant 0 : index
      %c0_13 = arith.constant 0 : index
      %13 = vector.load %arg3[%c0_11, %c0_12, %c0_13] : memref<4x8x128xbf16, #tpu.memory_space<vmem>>, vector<1x8x128xbf16>
      %14 = vector.shape_cast %13 : vector<1x8x128xbf16> to vector<8x128xbf16>
      %15 = arith.extf %14 : vector<8x128xbf16> to vector<8x128xf32>
      %16 = vector.broadcast %12 : vector<1x128xf32> to vector<8x128xf32>
      %17 = arith.mulf %16, %15 : vector<8x128xf32>
      %c1 = arith.constant 1 : index
      %c0_14 = arith.constant 0 : index
      %18 = vector.load %arg5[%c1, %c0_14] : memref<8x128xf32, #tpu.memory_space<vmem>>, vector<1x128xf32>
      %c1_15 = arith.constant 1 : index
      %c0_16 = arith.constant 0 : index
      %c0_17 = arith.constant 0 : index
      %19 = vector.load %arg3[%c1_15, %c0_16, %c0_17] : memref<4x8x128xbf16, #tpu.memory_space<vmem>>, vector<1x8x128xbf16>
      %20 = vector.shape_cast %19 : vector<1x8x128xbf16> to vector<8x128xbf16>
      %21 = arith.extf %20 : vector<8x128xbf16> to vector<8x128xf32>
      %22 = vector.broadcast %18 : vector<1x128xf32> to vector<8x128xf32>
      %23 = arith.mulf %22, %21 : vector<8x128xf32>
      %24 = arith.addf %17, %23 : vector<8x128xf32>
      %c2 = arith.constant 2 : index
      %c0_18 = arith.constant 0 : index
      %25 = vector.load %arg5[%c2, %c0_18] : memref<8x128xf32, #tpu.memory_space<vmem>>, vector<1x128xf32>
      %c2_19 = arith.constant 2 : index
      %c0_20 = arith.constant 0 : index
      %c0_21 = arith.constant 0 : index
      %26 = vector.load %arg3[%c2_19, %c0_20, %c0_21] : memref<4x8x128xbf16, #tpu.memory_space<vmem>>, vector<1x8x128xbf16>
      %27 = vector.shape_cast %26 : vector<1x8x128xbf16> to vector<8x128xbf16>
      %28 = arith.extf %27 : vector<8x128xbf16> to vector<8x128xf32>
      %29 = vector.broadcast %25 : vector<1x128xf32> to vector<8x128xf32>
      %30 = arith.mulf %29, %28 : vector<8x128xf32>
      %31 = arith.addf %24, %30 : vector<8x128xf32>
      %c3 = arith.constant 3 : index
      %c0_22 = arith.constant 0 : index
      %32 = vector.load %arg5[%c3, %c0_22] : memref<8x128xf32, #tpu.memory_space<vmem>>, vector<1x128xf32>
      %c3_23 = arith.constant 3 : index
      %c0_24 = arith.constant 0 : index
      %c0_25 = arith.constant 0 : index
      %33 = vector.load %arg3[%c3_23, %c0_24, %c0_25] : memref<4x8x128xbf16, #tpu.memory_space<vmem>>, vector<1x8x128xbf16>
      %34 = vector.shape_cast %33 : vector<1x8x128xbf16> to vector<8x128xbf16>
      %35 = arith.extf %34 : vector<8x128xbf16> to vector<8x128xf32>
      %36 = vector.broadcast %32 : vector<1x128xf32> to vector<8x128xf32>
      %37 = arith.mulf %36, %35 : vector<8x128xf32>
      %38 = arith.addf %31, %37 : vector<8x128xf32>
      %c4 = arith.constant 4 : index
      %c0_26 = arith.constant 0 : index
      %39 = vector.load %arg5[%c4, %c0_26] : memref<8x128xf32, #tpu.memory_space<vmem>>, vector<1x128xf32>
      %c0_27 = arith.constant 0 : index
      %c0_28 = arith.constant 0 : index
      %c0_29 = arith.constant 0 : index
      %40 = vector.load %arg3[%c0_27, %c0_28, %c0_29] : memref<4x8x128xbf16, #tpu.memory_space<vmem>>, vector<1x8x128xbf16>
      %41 = vector.shape_cast %40 : vector<1x8x128xbf16> to vector<8x128xbf16>
      %42 = arith.extf %41 : vector<8x128xbf16> to vector<8x128xf32>
      %43 = vector.broadcast %39 : vector<1x128xf32> to vector<8x128xf32>
      %44 = arith.mulf %43, %42 : vector<8x128xf32>
      %c5 = arith.constant 5 : index
      %c0_30 = arith.constant 0 : index
      %45 = vector.load %arg5[%c5, %c0_30] : memref<8x128xf32, #tpu.memory_space<vmem>>, vector<1x128xf32>
      %c1_31 = arith.constant 1 : index
      %c0_32 = arith.constant 0 : index
      %c0_33 = arith.constant 0 : index
      %46 = vector.load %arg3[%c1_31, %c0_32, %c0_33] : memref<4x8x128xbf16, #tpu.memory_space<vmem>>, vector<1x8x128xbf16>
      %47 = vector.shape_cast %46 : vector<1x8x128xbf16> to vector<8x128xbf16>
      %48 = arith.extf %47 : vector<8x128xbf16> to vector<8x128xf32>
      %49 = vector.broadcast %45 : vector<1x128xf32> to vector<8x128xf32>
      %50 = arith.mulf %49, %48 : vector<8x128xf32>
      %51 = arith.addf %44, %50 : vector<8x128xf32>
      %c6 = arith.constant 6 : index
      %c0_34 = arith.constant 0 : index
      %52 = vector.load %arg5[%c6, %c0_34] : memref<8x128xf32, #tpu.memory_space<vmem>>, vector<1x128xf32>
      %c2_35 = arith.constant 2 : index
      %c0_36 = arith.constant 0 : index
      %c0_37 = arith.constant 0 : index
      %53 = vector.load %arg3[%c2_35, %c0_36, %c0_37] : memref<4x8x128xbf16, #tpu.memory_space<vmem>>, vector<1x8x128xbf16>
      %54 = vector.shape_cast %53 : vector<1x8x128xbf16> to vector<8x128xbf16>
      %55 = arith.extf %54 : vector<8x128xbf16> to vector<8x128xf32>
      %56 = vector.broadcast %52 : vector<1x128xf32> to vector<8x128xf32>
      %57 = arith.mulf %56, %55 : vector<8x128xf32>
      %58 = arith.addf %51, %57 : vector<8x128xf32>
      %c7 = arith.constant 7 : index
      %c0_38 = arith.constant 0 : index
      %59 = vector.load %arg5[%c7, %c0_38] : memref<8x128xf32, #tpu.memory_space<vmem>>, vector<1x128xf32>
      %c3_39 = arith.constant 3 : index
      %c0_40 = arith.constant 0 : index
      %c0_41 = arith.constant 0 : index
      %60 = vector.load %arg3[%c3_39, %c0_40, %c0_41] : memref<4x8x128xbf16, #tpu.memory_space<vmem>>, vector<1x8x128xbf16>
      %61 = vector.shape_cast %60 : vector<1x8x128xbf16> to vector<8x128xbf16>
      %62 = arith.extf %61 : vector<8x128xbf16> to vector<8x128xf32>
      %63 = vector.broadcast %59 : vector<1x128xf32> to vector<8x128xf32>
      %64 = arith.mulf %63, %62 : vector<8x128xf32>
      %65 = arith.addf %58, %64 : vector<8x128xf32>
      %66 = tpu.concatenate %38, %65 in 0 : vector<8x128xf32>, vector<8x128xf32> -> vector<16x128xf32>
      %67 = arith.truncf %66 : vector<16x128xf32> to vector<16x128xbf16>
      %c0_42 = arith.constant 0 : index
      %c0_43 = arith.constant 0 : index
      %68 = vector.load %arg4[%c0_42, %c0_43] : memref<16x128xbf16, #tpu.memory_space<vmem>>, vector<16x128xbf16>
      tpu.vector_store %arg4[%c0_42, %c0_43], %67 {strides = array<i32>} : memref<16x128xbf16, #tpu.memory_space<vmem>>, vector<16x128xbf16>,
    } else {
    }
    return
  }
  func.func @transform_0(%arg0: i32) -> (i32, i32) {
    %c0_i32 = arith.constant 0 : i32
    %c0_i32_0 = arith.constant 0 : i32
    return %c0_i32, %arg0 : i32, i32
  }
  func.func @transform_1(%arg0: i32) -> (i32, i32) {
    %c0_i32 = arith.constant 0 : i32
    %c0_i32_0 = arith.constant 0 : i32
    return %arg0, %c0_i32 : i32, i32
  }
  func.func @transform_2(%arg0: i32) -> (i32, i32, i32) {
    %c0_i32 = arith.constant 0 : i32
    %c0_i32_0 = arith.constant 0 : i32
    %c0_i32_1 = arith.constant 0 : i32
    %c0_i32_2 = arith.constant 0 : i32
    return %c0_i32, %c0_i32_0, %c0_i32_1 : i32, i32, i32
  }
  func.func @transform_3(%arg0: i32) -> (i32, i32) {
    %c0_i32 = arith.constant 0 : i32
    %c0_i32_0 = arith.constant 0 : i32
    %c0_i32_1 = arith.constant 0 : i32
    return %c0_i32, %c0_i32_0 : i32, i32
  }
}

</mosaic_0001>

<bundles_post_ra>
// kernel: tpu_custom_call.1
= control target key start
LH: loop header
LB: loop body
LE: loop exit
PB: predicated region body
PF: predicated region fallthrough
CT: control target
= control target key end

     0   :  { %8 = vsyncpa [#allocation4], 0  ;;  %s1057_s0 = inlined_call_operand.hbm [shape: bf16[8,256], index: 0, kind: input, shape index: {}]   ;;  %s1058_s1 = inlined_call_operand.hbm [shape: bf16[256,128], index: 1, kind: input, shape index: {}]   ;;  %s1059_s2 = inlined_call_operand.hbm [shape: bf16[4,8,128], index: 2, kind: input, shape index: {}]   ;;  %s1060_s3 = inlined_call_operand.hbm [shape: bf16[16,128], index: 3, kind: output, shape index: {}]  }
   0x1   :  { %10 = vsyncpa [#allocation4 + $0x1], 0 }
   0x2   :  { %11 = vsyncpa [#allocation7], 0 }
   0x3   :  { %13 = vsyncpa [#allocation7 + $0x1], 0 }
   0x4   :  { %14 = vsyncpa [#allocation5], 0  ;;  %s853_s12 = smov 0   ;;  %s855_s13 = smov 0  }
   0x5   :  { %s857_s14 = smov 0   ;;  %s859_s15 = smov 0  }
   0x6 LB: > { %s872_s16 = sadd.s32 4294967295, %s820_s15   ;;  %p40_p0 = scmp.ne.s32.totalorder %s812_s13, %s808_s12  ;;  %s820_s15 = sphi %s859_s15, %s1074_s15   ;;  %s816_s14 = sphi %s857_s14, %s1073_s14   ;;  %s812_s13 = sphi %s855_s13, %s1072_s13   ;;  %s808_s12 = sphi %s853_s12, %s1071_s12  }
   0x7   : > { %p1061_p1 = scmp.eq.s32.totalorder %s872_s16, 0  ;;  %p514_p2 = scmp.ge.s32.totalorder %s820_s15, 1 }
   0x8   : > { %p119_p3 = scmp.lt.s32.totalorder %s820_s15, 3  ;;  %s822_s19 = smov [#allocation8]  }
   0x9   : > { %p881_p5 = por %p1061_p1, %p40_p0  ;;  %s131_s20 = sshll.u32 %s822_s19, 4  ;;  %s132_s20 = int_to_ptr.vmem [resolvable:$true] %s131_s20 }
   0xa   : > { %p885_p6 = pnand %p514_p2, %p119_p3  ;;  %s898_s22 = sadd.s32 1, %s820_s15  }
   0xb   : > { %s1063_s17 = scalar_select %p881_p5, 1, 0 }
   0xc   : > { %p603_p7 = pneg %p885_p6  ;;  %s27_s23 = sadd.s32 1, %s816_s14 }
   0xd   : > { %s24_s24 = ssub.s32 %s820_s15, %s898_s22  ;;  %s679_s25 = scalar_lea.vmem %s132_s20, 256 }
   0xe   : > { %p893_p8 = pnand %p603_p7, %p1061_p1  ;;  %p680_p10 = scmp.ne.s32.totalorder %s132_s20, %s679_s25 }
   0xf   : > { %p687_p13 = scmp.lt.s32.totalorder %s132_s20, %s132_s20  ;;  %p688_p0 = scmp.lt.s32.totalorder %s679_s25, %s679_s25 }
  0x10   : > { %p670_p9 = pneg %p893_p8 }
  0x11   : > { %p689_p2 = por %p688_p0, %p687_p13 }
  0x12   : > { %p682_p11 = pnand %p680_p10, %p670_p9 }
  0x14   : > { %p683_p12 = pneg %p682_p11 }
  0x16   : > { %p690_p3 = pnand %p689_p2, %p683_p12 }
  0x18   : > { %693 = shalt.err (!%p690_p3)
}
  0x19   : > { %s823_s26 = smov 64   ;;  %s824_s27 = smov 4  }
  0x1a   : > { %606 = dma.hbm_to_vmem [thread:$0]  (!%p893_p8), %s1059_s2, 256, %s132_s20, [#allocation7], %s823_s26, %s823_s26, %s824_s27  }
  0x1b   : > { %p25_p7 = scmp.eq.s32.totalorder %s24_s24, 0  ;;  %p34_p9 = scmp.ne.s32.totalorder %s816_s14, %s812_s13 }
  0x1c   : > { %p35_p10 = scmp.eq.s32.totalorder %s820_s15, 0  ;;  %p615_p11 = scmp.lt.s32.totalorder %s820_s15, 2 }
  0x1d   : > { %s918_s30 = scalar_select %p25_p7, %s816_s14, %s27_s23  }
  0x1e   : > { %p36_p12 = por %p35_p10, %p34_p9  ;;  %s921_s4 = sand.u32 1, %s816_s14  }
  0x1f   : > { %s517_s5 = sshll.u32 %s921_s4, 2  ;;  %s518_s6 = sshll.u32 %s820_s15, 6 }
  0x20   : > { %s928_s9 = scalar_lea.hbm %s1057_s0, %s518_s6  ;;  %s149_s10 = scalar_lea.vmem [#allocation3], %s517_s5 }
  0x21   : > { %s156_s11 = sshll.u32 %s149_s10, 4  ;;  %p932_p8 = pnand %p615_p11, %p36_p12  ;;  %s930_s11 = int_to_ptr.vmem [resolvable:$true] %s156_s11 }
  0x22   : > { %s519_s19 = sshll.u32 %s921_s4, 6  ;;  %s163_s20 = sand.u32 1, %s820_s15  }
  0x23   : > { %s146_s21 = scalar_lea.sflag [#allocation4], %s921_s4  ;;  %s694_s23 = scalar_lea.hbm %s928_s9, 64 }
  0x24   : > { %p695_p13 = scmp.ne.s32.totalorder %s928_s9, %s694_s23  ;;  %p696_p0 = pneg %p932_p8 }
  0x25   : > { %s699_s28 = scalar_lea.hbm %s1057_s0, 128  ;;  %p700_p7 = scmp.lt.s32.totalorder %s928_s9, %s1057_s0 }
  0x26   : > { %p697_p2 = pnand %p696_p0, %p695_p13  ;;  %p701_p9 = scmp.lt.s32.totalorder %s699_s28, %s694_s23 }
  0x28   : > { %p698_p3 = pneg %p697_p2  ;;  %p702_p10 = por %p701_p9, %p700_p7 }
  0x2a   : > { %p703_p11 = pnand %p702_p10, %p698_p3 }
  0x2c   : > { %706 = shalt.err (!%p703_p11)
}
  0x2d   : > { %s707_s6 = scalar_lea.vmem %s930_s11, 64  ;;  %s825_s7 = smov [#allocation3]  }
  0x2e   : > { %p708_p12 = scmp.ne.s32.totalorder %s930_s11, %s707_s6  ;;  %s712_s8 = sshll.u32 %s825_s7, 4  ;;  %s713_s8 = int_to_ptr.vmem [resolvable:$false] %s712_s8 }
  0x2f   : > { %s714_s10 = scalar_lea.vmem %s713_s8, 128  ;;  %p715_p4 = scmp.lt.s32.totalorder %s930_s11, %s713_s8 }
  0x30   : > { %p710_p13 = pnand %p708_p12, %p696_p0  ;;  %p716_p1 = scmp.lt.s32.totalorder %s714_s10, %s707_s6 }
  0x32   : > { %p711_p2 = pneg %p710_p13  ;;  %p717_p5 = por %p716_p1, %p715_p4 }
  0x34   : > { %p718_p7 = pnand %p717_p5, %p711_p2 }
  0x36   : > { %721 = shalt.err (!%p718_p7)
}
  0x37   : > { %610 = dma.hbm_to_vmem [thread:$0]  (!%p932_p8), %s928_s9, 64, %s930_s11, %s146_s21  }
  0x38   : > { %s167_s23 = scalar_lea.vmem [#allocation6], %s519_s19  ;;  %s550_s25 = sshll.u32 %s820_s15, 10 }
  0x39   : > { %s174_s24 = sshll.u32 %s167_s23, 4  ;;  %s971_s5 = scalar_lea.hbm %s1058_s1, %s550_s25  ;;  %s965_s24 = int_to_ptr.vmem [resolvable:$true] %s174_s24 }
  0x3a   : > { %s164_s6 = scalar_lea.sflag [#allocation7], %s163_s20  ;;  %s722_s7 = scalar_lea.hbm %s971_s5, 1024 }
  0x3b   : > { %p723_p1 = scmp.ne.s32.totalorder %s971_s5, %s722_s7  ;;  %s727_s11 = scalar_lea.hbm %s1058_s1, 2048 }
  0x3c   : > { %p728_p3 = scmp.lt.s32.totalorder %s971_s5, %s1058_s1  ;;  %p729_p9 = scmp.lt.s32.totalorder %s727_s11, %s722_s7 }
  0x3d   : > { %p725_p4 = pnand %p723_p1, %p696_p0 }
  0x3e   : > { %p730_p10 = por %p729_p9, %p728_p3 }
  0x3f   : > { %p726_p5 = pneg %p725_p4 }
  0x41   : > { %p731_p11 = pnand %p730_p10, %p726_p5 }
  0x43   : > { %734 = shalt.err (!%p731_p11)
}
  0x44   : > { %s735_s15 = scalar_lea.vmem %s965_s24, 1024  ;;  %s826_s20 = smov [#allocation6]  }
  0x45   : > { %p736_p12 = scmp.ne.s32.totalorder %s965_s24, %s735_s15  ;;  %s740_s8 = sshll.u32 %s826_s20, 4  ;;  %s741_s8 = int_to_ptr.vmem [resolvable:$false] %s740_s8 }
  0x46   : > { %s742_s10 = scalar_lea.vmem %s741_s8, 2048  ;;  %p743_p7 = scmp.lt.s32.totalorder %s965_s24, %s741_s8 }
  0x47   : > { %p738_p13 = pnand %p736_p12, %p696_p0  ;;  %p744_p1 = scmp.lt.s32.totalorder %s742_s10, %s735_s15 }
  0x49   : > { %p739_p2 = pneg %p738_p13  ;;  %p745_p4 = por %p744_p1, %p743_p7 }
  0x4b   : > { %p746_p3 = pnand %p745_p4, %p739_p2 }
  0x4d   : > { %749 = shalt.err (!%p746_p3)
}
  0x4e   : > { %613 = dma.hbm_to_vmem [thread:$0]  (!%p932_p8), %s971_s5, 1024, %s965_s24, %s164_s6, %s823_s26, %s823_s26, %s824_s27  }
  0x4f   : > { %186 = sbr.rel (%p885_p6) target bundleno = 364 (0x16c), region = 32  ;;  %s188_s23 = sand.u32 (!%p885_p6), 1, %s812_s13  }
  0x50   : > { %s523_s25 = sshll.u32 (!%p885_p6), %s188_s23, 2  ;;  %s189_s28 = scalar_lea.sflag (!%p885_p6), [#allocation4], %s188_s23 }
  0x51   : > { %s1003_s29 = scalar_lea.vmem (!%p885_p6), [#allocation3], %s523_s25  ;;  %p1067_p0 = scmp.ne.s32.totalorder (!%p885_p6), %s1063_s17, 0 }
  0x54   : > { %791 = dma.done.wait (%p1067_p0), %s189_s28, 64  }
  0x55   : > { %793 = vsyncadd (%p1067_p0), %s189_s28, 4294967232  ;;  %s197_s12 = sand.u32 1, %s872_s16   ;;  %s524_s7 = sshll.u32 %s188_s23, 6 }
  0x56   : > { %s198_s26 = scalar_lea.sflag [#allocation7], %s197_s12  ;;  %s1010_s27 = scalar_lea.vmem [#allocation6], %s524_s7 }
  0x57   : > { %795 = dma.done.wait (%p1067_p0), %s198_s26, 1024  }
  0x58   : > { %797 = vsyncadd (%p1067_p0), %s198_s26, 4294966272  ;;  %p1068_p6 = scmp.eq.s32.totalorder %s872_s16, 0 }
  0x5a   : > { %799 = dma.done.wait (%p1068_p6), [#allocation7], 256   ;;  %p1069_p8 = pmov %p1068_p6 }
  0x5b   : > { %p1070_p5 = scmp.ne.s32.totalorder %s872_s16, 0 }
  0x5c   : > { %801 = vsyncadd (%p1069_p8), [#allocation7], 4294967040 }
  0x5d   : > { %233 = sbr.rel (%p1070_p5) target bundleno = 100 (0x64), region = 48 }
  0x62   : > { %v827_v0 = vmov 0.0  }
  0x63   : > { %234 = vst [vmem:[#allocation2] sm:$0xff] %v827_v0 }
  0x64 PF: > { %v660_v1 = vld [vmem:[%s1010_s27 + $0x38] sm:$0xff]   ;;  %v828_v2 = vmov 0.0   ;;  %v661_v3 = vld [vmem:[%s1010_s27 + $0x30] sm:$0xff]   ;;  %vm829_vm0 = vmmov 0   ;;  %v662_v4 = vld [vmem:[%s1010_s27 + $0x28] sm:$0xff]   ;;  %p535_p9 = scmp.ne.s32.totalorder %s872_s16, 1 }
  0x65   : > { %571 = vmatprep.subr.bf16.mxu0 %v828_v2  ;;  %587 = vmatprep.mubr.msk.bf16.mxu0 %vm829_vm0, %v828_v2  ;;  %v663_v5 = vld [vmem:[%s1010_s27 + $0x20] sm:$0xff]   ;;  %v664_v6 = vld [vmem:[%s1010_s27 + $0x18] sm:$0xff]   ;;  %v665_v7 = vld [vmem:[%s1010_s27 + $0x10] sm:$0xff]  }
  0x66   : > { %572 = vmatpush3.bf16.msra.mxu0 %v660_v1  ;;  %v666_v8 = vld [vmem:[%s1010_s27 + $0x8] sm:$0xff]   ;;  %v667_v9 = vld [vmem:[%s1010_s27] sm:$0xff]   ;;  %v236_v10 = vld [vmem:[%s1003_s29] sm:$0xf] }
  0x67   : > { %573 = vmatprep.subr.bf16.mxu0 %v828_v2 }
  0x6a   : > { %574 = vmatpush3.bf16.msra.mxu0 %v661_v3  ;;  %v235_v11 = vld [vmem:[#allocation2] sm:$0xff] }
  0x6b   : > { %575 = vmatprep.subr.bf16.mxu0 %v828_v2 }
  0x6e   : > { %576 = vmatpush3.bf16.msra.mxu0 %v662_v4 }
  0x6f   : > { %577 = vmatprep.subr.bf16.mxu0 %v828_v2 }
  0x72   : > { %578 = vmatpush3.bf16.msra.mxu0 %v663_v5 }
  0x73   : > { %579 = vmatprep.subr.bf16.mxu0 %v828_v2 }
  0x76   : > { %580 = vmatpush3.bf16.msra.mxu0 %v664_v6 }
  0x77   : > { %581 = vmatprep.subr.bf16.mxu0 %v828_v2 }
  0x7a   : > { %582 = vmatpush3.bf16.msra.mxu0 %v665_v7 }
  0x7b   : > { %583 = vmatprep.subr.bf16.mxu0 %v828_v2 }
  0x7e   : > { %584 = vmatpush3.bf16.msra.mxu0 %v666_v8 }
  0x7f   : > { %585 = vmatprep.subr.bf16.mxu0 %v828_v2 }
  0x82   : > { %586 = vmatpush3.bf16.msra.mxu0 %v667_v9 }
  0x85   : > { %588 = vmatmul.mubr.bf16.vlgmr.msra.gmra.mxu0 %v236_v10 }
 0x145   : > { %v335_v12 = vpop.f32.mrf.mxu0 }
 0x146   : > { %v341_v13 = vadd.f32 %v335_v12, %v235_v11 }
 0x147   : > { %v589_v14 = vpop.f32.mrf.mxu0  ;;  %346 = sbr.rel (%p535_p9) target bundleno = 348 (0x15c), region = 52 }
 0x148   : > { %342 = vst [vmem:[#allocation2] sm:$0xff] %v341_v13 }
 0x149   : > { %v338_v15 = vpop.f32.mrf.mxu0 }
 0x14b   : > { %v590_v16 = vpop.f32.mrf.mxu0 }
 0x14c   : > { %v554_v18 = vld [vmem:[#allocation8] sm:$0xff]   ;;  %v367_v23 = vld [vmem:[#allocation8 + $0x8] sm:$0xff]  }
 0x14d   : > { %v555_v20 = vunpack.c.l.bf16 %v554_v18  ;;  %v556_v21 = vunpack.c.h.bf16 %v554_v18  ;;  %v368_v25 = vunpack.c.l.bf16 %v367_v23  ;;  %v378_v26 = vunpack.c.h.bf16 %v367_v23 }
 0x14f   : > { %v536_v17 = vld [vmem:[#allocation2] ss:$0 sm:$0xff]  ;;  %v537_v19 = vld [vmem:[#allocation2 + $0x1] ss:$0 sm:$0xff]  ;;  %v538_v22 = vld [vmem:[#allocation2 + $0x2] ss:$0 sm:$0xff] }
 0x150   : > { %v539_v24 = vld [vmem:[#allocation2 + $0x3] ss:$0 sm:$0xff]  ;;  %v540_v27 = vld [vmem:[#allocation2 + $0x4] ss:$0 sm:$0xff]  ;;  %v541_v28 = vld [vmem:[#allocation2 + $0x5] ss:$0 sm:$0xff]  ;;  %v354_v30 = vmul.f32 %v555_v20, %v536_v17  ;;  %v363_v31 = vmul.f32 %v556_v21, %v537_v19  ;;  %v373_v35 = vmul.f32 %v538_v22, %v368_v25 }
 0x151   : > { %v542_v29 = vld [vmem:[#allocation2 + $0x6] ss:$0 sm:$0xff]  ;;  %v390_v32 = vmul.f32 %v555_v20, %v540_v27  ;;  %v396_v33 = vmul.f32 %v556_v21, %v541_v28  ;;  %v543_v34 = vld [vmem:[#allocation2 + $0x7] ss:$0 sm:$0xff]  ;;  %v383_v38 = vmul.f32 %v539_v24, %v378_v26 }
 0x152   : > { %v403_v36 = vmul.f32 %v542_v29, %v368_v25  ;;  %v364_v37 = vadd.f32 %v363_v31, %v354_v30  ;;  %v410_v40 = vmul.f32 %v543_v34, %v378_v26 }
 0x153   : > { %v397_v39 = vadd.f32 %v396_v33, %v390_v32 }
 0x154   : > { %v374_v41 = vadd.f32 %v373_v35, %v364_v37 }
 0x155   : > { %v404_v42 = vadd.f32 %v403_v36, %v397_v39 }
 0x156   : > { %v384_v43 = vadd.f32 %v383_v38, %v374_v41 }
 0x157   : > { %v411_v44 = vadd.f32 %v410_v40, %v404_v42 }
 0x159   : > { %v560_v45 = vpack.c.bf16 %v411_v44, %v384_v43 }
 0x15b   : > { %561 = vst [vmem:[#allocation9] sm:$0xff] %v560_v45  }
 0x15c PF: > { %p617_p10 = scmp.eq.s32.totalorder %s872_s16, 1  ;;  %s830_s17 = smov [#allocation9]  }
 0x15d   : > { %s428_s18 = sshll.u32 %s830_s17, 4  ;;  %s429_s18 = int_to_ptr.vmem [resolvable:$true] %s428_s18 }
 0x15e   : > { %s750_s24 = scalar_lea.vmem %s429_s18, 128  ;;  %p757_p2 = scmp.lt.s32.totalorder %s429_s18, %s429_s18 }
 0x15f   : > { %p751_p11 = scmp.ne.s32.totalorder %s429_s18, %s750_s24  ;;  %p758_p7 = scmp.lt.s32.totalorder %s750_s24, %s750_s24 }
 0x161   : > { %p752_p12 = pnand %p751_p11, %p617_p10  ;;  %p759_p1 = por %p758_p7, %p757_p2 }
 0x163   : > { %p753_p13 = pneg %p752_p12 }
 0x165   : > { %p760_p4 = pnand %p759_p1, %p753_p13 }
 0x167   : > { %763 = shalt.err (!%p760_p4)
}
 0x168   : > { %s831_s5 = smov 64   ;;  %s832_s6 = smov 4  }
 0x169   : > { %600 = dma.vmem_to_hbm [thread:$0]  (%p617_p10), %s429_s18, 128, %s1060_s3, [#allocation5], %s831_s5, %s831_s5, %s832_s6  }
 0x16a   : > { %803 = dma.done.wait (%p617_p10), [#allocation5], 128  }
 0x16b   : > { %805 = vsyncadd (%p617_p10), [#allocation5], 4294967168 }
 0x16c PF: > { %p17_p3 = scmp.ge.s32.totalorder %s898_s22, 4   ;;  %s1071_s12 = smov %s812_s13 }
 0x16d   : > { %s1072_s13 = smov %s816_s14  ;;  %s1073_s14 = smov %s918_s30 }
 0x16e   : > { %s1074_s15 = smov %s898_s22  ;;  %19 = sbr.rel (!%p17_p3) target bundleno = 6 (0x6), region = 97 }
 0x173   :  { %444 = vsyncpa [#allocation4], 1 }
 0x174   :  { %446 = vsyncpa [#allocation4 + $0x1], 1 }
 0x175   :  { %447 = vsyncpa [#allocation7], 1 }
 0x176   :  { %449 = vsyncpa [#allocation7 + $0x1], 1 }
 0x177   :  { %450 = vsyncpa [#allocation5], 1 }
 0x178   :  { %452 = vsyncpa [#allocation5 + $0x1], 1 }

</bundles_post_ra>
